<compile_context>
chip_gen: v7x
topology: tpu7x:2x2x1
jax: 0.10.0
libtpu: 0.0.40
codegen_flags: <defaults>
</compile_context>

<pallas_src>
import functools

import jax
import jax.numpy as jnp
from jax.experimental import pallas as pl
from jax.experimental.pallas import tpu as pltpu

_NEG_SLOPE = 0.05          # LeakyReLU slope used by GATLayer
_MASK = -1e30              # score for non-edges (exp -> exactly 0)
_LANE = 128                # pad hidden / class dims to full lane width


def _round_up(x, m):
    return (x + m - 1) // m * m


def _vmem_caps():
    """Per-generation (vmem_limit_bytes, tile-sizing budget)."""
    phys = 64 * 2**20                      # conservative default (v7x per-TC)
    try:
        phys = int(pltpu.get_tpu_info().vmem_capacity_bytes)
    except Exception:
        pass
    if phys > 96 * 2**20:                  # v5e / v6e: 128 MiB per core
        return 100 * 2**20, 88 * 2**20
    return 48 * 2**20, 40 * 2**20          # v7x: 64 MiB per TensorCore


def _proj_row_tile(n, nfeat, hp, budget):
    """Row tile for the projection kernel (multiple of 8, grid >= 2)."""
    if n <= 8:
        return n
    resident = (nfeat * hp + hp * 2 + 2) * 4
    per_row = 2 * (nfeat * 4 + hp * 2 + 2 * 4) + 3 * hp * 4   # DB'd tiles + f32 temps
    tm = max((budget - resident) // per_row, 8)
    tm = min(tm, -(-n // 2), 2048)
    return max(8, (tm // 8) * 8)


def _attn_row_tile(n, hp, cp, budget):
    """Row tile for the attention kernels (multiple of 32 for int8 adj)."""
    if n <= 32:
        return n
    resident = n * 4 + n * hp * 2 + hp * cp * 4 + cp * 4       # mdst + bf16 z + wf + bf
    per_row = n * (2 * 1 + 3 * 4) + 2 * (hp + cp + 2) * 4      # adj DB + f32 temps + outs
    tm = max((budget - resident) // per_row, 32)
    tm = min(tm, -(-n // 2), 1024)                             # >=2 grid steps (megacore)
    return max(32, (tm // 32) * 32)


# ---------------------------------------------------------------------------
# Projection kernel (row-tiled): z = [relu](x) @ W ; m = z @ [a_src|a_dst] + [b,0]
# ---------------------------------------------------------------------------
def _proj_kernel(x_ref, w_ref, a_ref, b_ref, z_ref, m_ref, *, input_relu: bool):
    x = x_ref[...]
    if input_relu:                               # fused ReLU on the layer input
        x = jnp.maximum(x, 0.0)
    z = jnp.dot(x, w_ref[...], preferred_element_type=jnp.float32)        # (tm, Hp)
    z_ref[...] = z.astype(z_ref.dtype)                                    # bf16 values
    # both attention projections in one (Hp, 2) matmul; a-bias folded via [b, 0]
    m_ref[...] = jnp.dot(z, a_ref[...], preferred_element_type=jnp.float32) + b_ref[...]


def gat_projection(x, w, a, b, *, input_relu=False):
    n, nfeat = x.shape
    hp = w.shape[1]
    limit, budget = _vmem_caps()
    tm = _proj_row_tile(n, nfeat, hp, budget)
    kernel = functools.partial(_proj_kernel, input_relu=input_relu)
    return pl.pallas_call(
        kernel,
        out_shape=(jax.ShapeDtypeStruct((n, hp), jnp.bfloat16),   # z (bf16 for MXU)
                   jax.ShapeDtypeStruct((n, 2), jnp.float32)),    # [m_src+b, m_dst]
        grid=(pl.cdiv(n, tm),),
        in_specs=[
            pl.BlockSpec((tm, nfeat), lambda i: (i, 0)),   # x tile (streamed)
            pl.BlockSpec((nfeat, hp), lambda i: (0, 0)),   # W (resident)
            pl.BlockSpec((hp, 2), lambda i: (0, 0)),       # [a_src | a_dst]
            pl.BlockSpec((1, 2), lambda i: (0, 0)),        # [b, 0]
        ],
        out_specs=(pl.BlockSpec((tm, hp), lambda i: (i, 0)),
                   pl.BlockSpec((tm, 2), lambda i: (i, 0))),
        compiler_params=pltpu.CompilerParams(
            dimension_semantics=("parallel",),
            vmem_limit_bytes=limit),
    )(x, w, a, b)


# ---------------------------------------------------------------------------
# Attention kernel (layer 1): row-tiled stable masked softmax + e @ z
# ---------------------------------------------------------------------------
def _attn_kernel(msrc_ref, mdst_ref, adj_ref, z_ref, out_ref):
    s = msrc_ref[...] + mdst_ref[...]                 # (tm, N) pure VPU broadcast
    s = jnp.maximum(s, _NEG_SLOPE * s)                # LeakyReLU(0.05)
    s = jnp.where(adj_ref[...] != 0, s, _MASK)        # int8 mask -> -1e30 off edges
    rmax = jnp.maximum(jnp.max(s, axis=1, keepdims=True), 0.0)   # stable, all-masked->0
    e = jnp.exp(s - rmax)
    denom = jnp.sum(e, axis=1, keepdims=True)
    h = jnp.dot(e.astype(jnp.bfloat16), z_ref[...],   # bf16 MXU matmul
                preferred_element_type=jnp.float32)
    safe = jnp.where(denom == 0.0, 1.0, denom)        # isolated rows -> 0 output
    out_ref[...] = h * pl.reciprocal(safe, approx=True)   # deferred normalization


def gat_attention(m_src, m_dst_row, adj, z):
    n, hp = z.shape
    limit, budget = _vmem_caps()
    tm = _attn_row_tile(n, hp, 0, budget)
    return pl.pallas_call(
        _attn_kernel,
        out_shape=jax.ShapeDtypeStruct((n, hp), jnp.float32),
        grid=(pl.cdiv(n, tm),),
        in_specs=[
            pl.BlockSpec((tm, 1), lambda i: (i, 0)),   # m_src tile
            pl.BlockSpec((1, n), lambda i: (0, 0)),    # m_dst row (resident)
            pl.BlockSpec((tm, n), lambda i: (i, 0)),   # int8 adjacency tile (streamed)
            pl.BlockSpec((n, hp), lambda i: (0, 0)),   # z bf16 (resident)
        ],
        out_specs=pl.BlockSpec((tm, hp), lambda i: (i, 0)),
        compiler_params=pltpu.CompilerParams(
            dimension_semantics=("parallel",),
            vmem_limit_bytes=limit),
    )(m_src, m_dst_row, adj, z)


# ---------------------------------------------------------------------------
# Attention kernel (layer 2) fused with the classifier head:
# stable masked softmax + e @ z + ReLU + Linear + log_softmax.
# The per-row attention log-sum-exp is packed into the last padded class lane
# (single lane-dense output, no width-1 stores).
# ---------------------------------------------------------------------------
def _attn_cls_kernel(msrc_ref, mdst_ref, adj_ref, z_ref, wf_ref, bf_ref,
                     out_ref, *, nclass: int, cp: int):
    s = msrc_ref[...] + mdst_ref[...]
    s = jnp.maximum(s, _NEG_SLOPE * s)
    s = jnp.where(adj_ref[...] != 0, s, _MASK)
    rmax = jnp.maximum(jnp.max(s, axis=1, keepdims=True), 0.0)
    e = jnp.exp(s - rmax)
    denom = jnp.sum(e, axis=1, keepdims=True)
    lse_attn = rmax + jnp.log(denom)                  # per-row LSE for per-edge alpha
    h = jnp.dot(e.astype(jnp.bfloat16), z_ref[...],
                preferred_element_type=jnp.float32)   # (tm, Hp)
    safe = jnp.where(denom == 0.0, 1.0, denom)
    h = h * pl.reciprocal(safe, approx=True)
    h = jnp.maximum(h, 0.0)                           # ReLU
    logits = jnp.dot(h, wf_ref[...], preferred_element_type=jnp.float32) + bf_ref[...]
    lane = jax.lax.broadcasted_iota(jnp.int32, logits.shape, 1)
    logits = jnp.where(lane < nclass, logits, _MASK)  # padded class lanes -> 0 prob
    m = jnp.max(logits, axis=1, keepdims=True)
    zc = logits - m
    logp = zc - jnp.log(jnp.sum(jnp.exp(zc), axis=1, keepdims=True))
    out_ref[...] = jnp.where(lane == cp - 1, lse_attn, logp)


def gat_attention_classifier(m_src, m_dst_row, adj, z, wf, bf, *, nclass):
    n, hp = z.shape
    cp = wf.shape[1]
    limit, budget = _vmem_caps()
    tm = _attn_row_tile(n, hp, cp, budget)
    kernel = functools.partial(_attn_cls_kernel, nclass=nclass, cp=cp)
    return pl.pallas_call(
        kernel,
        out_shape=jax.ShapeDtypeStruct((n, cp), jnp.float32),   # logp (+ LSE in lane cp-1)
        grid=(pl.cdiv(n, tm),),
        in_specs=[
            pl.BlockSpec((tm, 1), lambda i: (i, 0)),
            pl.BlockSpec((1, n), lambda i: (0, 0)),
            pl.BlockSpec((tm, n), lambda i: (i, 0)),
            pl.BlockSpec((n, hp), lambda i: (0, 0)),
            pl.BlockSpec((hp, cp), lambda i: (0, 0)),
            pl.BlockSpec((1, cp), lambda i: (0, 0)),
        ],
        out_specs=pl.BlockSpec((tm, cp), lambda i: (i, 0)),
        compiler_params=pltpu.CompilerParams(
            dimension_semantics=("parallel",),
            vmem_limit_bytes=limit),
    )(m_src, m_dst_row, adj, z, wf, bf)


# ---------------------------------------------------------------------------
# Full GNN forward
# ---------------------------------------------------------------------------
def gnn_forward(x, adj, edge_index, params, *, nclass):
    p = params
    # ---- layer 1 (its per-edge alpha is discarded by the reference forward) ----
    z1, m1 = gat_projection(x, p["w1"], p["a1"], p["b1"], input_relu=False)
    h1 = gat_attention(m1[:, 0:1], jnp.reshape(m1[:, 1], (1, -1)), adj, z1)
    # dropout: eval-mode identity.
    # TODO(synk): training-mode dropout (Bernoulli mask via pltpu.prng_*) not wired in.
    # ---- layer 2 (input ReLU fused into projection; classifier fused into attention) ----
    z2, m2 = gat_projection(h1, p["w2"], p["a2"], p["b2"], input_relu=True)
    out = gat_attention_classifier(m2[:, 0:1], jnp.reshape(m2[:, 1], (1, -1)),
                                   adj, z2, p["wf"], p["bf"], nclass=nclass)
    cp = out.shape[1]
    logp = out[:, :nclass]
    lse2 = out[:, cp - 1]                       # per-row attention log-sum-exp (layer 2)
    # per-edge alpha of layer 2, rebuilt consistently from the exported LSE
    src, dst = edge_index[0], edge_index[1]
    s_e = m2[src, 0] + m2[dst, 1]
    s_e = jnp.maximum(s_e, _NEG_SLOPE * s_e)
    alpha_edges = jnp.exp(s_e - lse2[src])
    return logp, alpha_edges


# ---------------------------------------------------------------------------
# Deterministic parameter / input construction
# ---------------------------------------------------------------------------
def init_params(key, nfeat, nhid, nclass):
    ks = jax.random.split(key, 8)
    scale = 0.1
    return {
        # GATLayer 1: fc (nfeat -> nhid, no bias), a (2*nhid -> 1) with bias
        "w1": scale * jax.random.normal(ks[0], (nfeat, nhid), jnp.float32),
        "a1_src": scale * jax.random.normal(ks[1], (nhid, 1), jnp.float32),
        "a1_dst": scale * jax.random.normal(ks[2], (nhid, 1), jnp.float32),
        "a1_b": scale * jax.random.normal(ks[3], (1,), jnp.float32),
        # GATLayer 2
        "w2": scale * jax.random.normal(ks[4], (nhid, nhid), jnp.float32),
        "a2_src": scale * jax.random.normal(ks[5], (nhid, 1), jnp.float32),
        "a2_dst": scale * jax.random.normal(ks[6], (nhid, 1), jnp.float32),
        "a2_b": jnp.zeros((1,), jnp.float32),
        # final fc (nhid -> nclass) with bias
        "wf": scale * jax.random.normal(ks[7], (nhid, nclass), jnp.float32),
        "bf": jnp.zeros((1, nclass), jnp.float32),
    }


def pad_params(p, nfeat, nhid, nclass):
    """Zero-pad hidden / class dims to 128 lanes; pack [a_src | a_dst] per layer."""
    hp = _round_up(max(nhid, 8), _LANE)
    cp = _round_up(max(nclass + 1, 8), _LANE)   # keep >=1 spare lane for the LSE

    def pad2(a, r, c):
        return jnp.zeros((r, c), jnp.float32).at[:a.shape[0], :a.shape[1]].set(a)

    def pack_a(a_src, a_dst):
        return jnp.concatenate([pad2(a_src, hp, 1), pad2(a_dst, hp, 1)], axis=1)

    return {
        "w1": pad2(p["w1"], nfeat, hp),
        "a1": pack_a(p["a1_src"], p["a1_dst"]),
        "b1": jnp.array([[float(p["a1_b"][0]), 0.0]], jnp.float32),
        "w2": pad2(p["w2"], hp, hp),
        "a2": pack_a(p["a2_src"], p["a2_dst"]),
        "b2": jnp.array([[float(p["a2_b"][0]), 0.0]], jnp.float32),
        "wf": pad2(p["wf"], hp, cp),
        "bf": pad2(p["bf"], 1, cp),
    }


def build_ring_graph(n):
    """Self-loops + bidirectional ring; returns int8 {0,1} adjacency mask."""
    src, dst = [], []
    for i in range(n):
        for j in (i, (i + 1) % n, (i - 1) % n):
            src.append(i)
            dst.append(j)
    edge_index = jnp.array([src, dst], dtype=jnp.int32)            # (2, E)
    adj = jnp.zeros((n, n), jnp.int8).at[edge_index[0], edge_index[1]].set(1)
    return adj, edge_index


if __name__ == "__main__":
    N, NFEAT, NHID, NCLASS = 128, 8, 32, 4

    key = jax.random.PRNGKey(0)
    kx, kp = jax.random.split(key)
    x = jax.random.normal(kx, (N, NFEAT), jnp.float32)
    params = pad_params(init_params(kp, NFEAT, NHID, NCLASS), NFEAT, NHID, NCLASS)
    adj, edge_index = build_ring_graph(N)

    logp, alpha = gnn_forward(x, adj, edge_index, params, nclass=NCLASS)
    jax.block_until_ready((logp, alpha))

    assert logp.shape == (N, NCLASS)
    assert alpha.shape == (edge_index.shape[1],)
    # log_softmax rows must sum (in prob space) to ~1
    assert jnp.allclose(jnp.sum(jnp.exp(logp), axis=1), 1.0, atol=1e-4)
    # attention rows must sum to ~1 per source node with >=1 edge
    assert jnp.allclose(
        jnp.zeros(N, jnp.float32).at[edge_index[0]].add(alpha), 1.0, atol=1e-4)

    print("KERNEL_OK")
</pallas_src>

<mosaic_0001>
module attributes {stable_mosaic.version = 11 : i64} {
  func.func @_proj_kernel(%arg0: i32, %arg1: memref<64x8xf32, #tpu.memory_space<vmem>>, %arg2: memref<8x128xf32, #tpu.memory_space<vmem>>, %arg3: memref<128x2xf32, #tpu.memory_space<vmem>>, %arg4: memref<1x2xf32, #tpu.memory_space<vmem>>, %arg5: memref<64x128xbf16, #tpu.memory_space<vmem>>, %arg6: memref<64x2xf32, #tpu.memory_space<vmem>>) attributes {dimension_semantics = [#tpu.dimension_semantics<parallel>], iteration_bounds = array<i64: 2>, scalar_prefetch = 0 : i64, scratch_operands = 0 : i64, tpu.core_type = #tpu.core_type<tc>, window_params = [{transform_indices = @transform_0, window_bounds = array<i64: 64, 8>}, {pipeline_mode = #tpu.pipeline_mode<synchronous>, transform_indices = @transform_1, window_bounds = array<i64: 8, 128>}, {pipeline_mode = #tpu.pipeline_mode<synchronous>, transform_indices = @transform_2, window_bounds = array<i64: 128, 2>}, {pipeline_mode = #tpu.pipeline_mode<synchronous>, transform_indices = @transform_3, window_bounds = array<i64: 1, 2>}, {transform_indices = @transform_4, window_bounds = array<i64: 64, 128>}, {transform_indices = @transform_5, window_bounds = array<i64: 64, 2>}]} {
    %c0 = arith.constant 0 : index
    %c0_0 = arith.constant 0 : index
    %0 = vector.load %arg1[%c0, %c0_0] : memref<64x8xf32, #tpu.memory_space<vmem>>, vector<64x8xf32>
    %c0_1 = arith.constant 0 : index
    %c0_2 = arith.constant 0 : index
    %1 = vector.load %arg2[%c0_1, %c0_2] : memref<8x128xf32, #tpu.memory_space<vmem>>, vector<8x128xf32>
    %cst = arith.constant dense<0.000000e+00> : vector<64x128xf32>
    %2 = tpu.matmul %0, %1, %cst {dimension_numbers = #tpu.dot_dimension_numbers<[1], [0], [0], [1], [0, 0, 1, 1], [], []>} : vector<64x8xf32>, vector<8x128xf32>, vector<64x128xf32> -> vector<64x128xf32>
    %3 = arith.truncf %2 : vector<64x128xf32> to vector<64x128xbf16>
    %c0_3 = arith.constant 0 : index
    %c0_4 = arith.constant 0 : index
    %4 = vector.load %arg5[%c0_3, %c0_4] : memref<64x128xbf16, #tpu.memory_space<vmem>>, vector<64x128xbf16>
    tpu.vector_store %arg5[%c0_3, %c0_4], %3 {strides = array<i32>} : memref<64x128xbf16, #tpu.memory_space<vmem>>, vector<64x128xbf16>,
    %c0_5 = arith.constant 0 : index
    %c0_6 = arith.constant 0 : index
    %5 = vector.load %arg3[%c0_5, %c0_6] : memref<128x2xf32, #tpu.memory_space<vmem>>, vector<128x2xf32>
    %cst_7 = arith.constant dense<0.000000e+00> : vector<64x2xf32>
    %6 = tpu.matmul %2, %5, %cst_7 {dimension_numbers = #tpu.dot_dimension_numbers<[1], [0], [0], [1], [0, 0, 1, 1], [], []>} : vector<64x128xf32>, vector<128x2xf32>, vector<64x2xf32> -> vector<64x2xf32>
    %c0_8 = arith.constant 0 : index
    %c0_9 = arith.constant 0 : index
    %7 = vector.load %arg4[%c0_8, %c0_9] : memref<1x2xf32, #tpu.memory_space<vmem>>, vector<1x2xf32>
    %8 = vector.broadcast %7 : vector<1x2xf32> to vector<64x2xf32>
    %9 = arith.addf %6, %8 : vector<64x2xf32>
    %c0_10 = arith.constant 0 : index
    %c0_11 = arith.constant 0 : index
    %10 = vector.load %arg6[%c0_10, %c0_11] : memref<64x2xf32, #tpu.memory_space<vmem>>, vector<64x2xf32>
    tpu.vector_store %arg6[%c0_10, %c0_11], %9 {strides = array<i32>} : memref<64x2xf32, #tpu.memory_space<vmem>>, vector<64x2xf32>,
    return
  }
  func.func @transform_0(%arg0: i32) -> (i32, i32) {
    %c0_i32 = arith.constant 0 : i32
    %c0_i32_0 = arith.constant 0 : i32
    return %arg0, %c0_i32 : i32, i32
  }
  func.func @transform_1(%arg0: i32) -> (i32, i32) {
    %c0_i32 = arith.constant 0 : i32
    %c0_i32_0 = arith.constant 0 : i32
    %c0_i32_1 = arith.constant 0 : i32
    return %c0_i32, %c0_i32_0 : i32, i32
  }
  func.func @transform_2(%arg0: i32) -> (i32, i32) {
    %c0_i32 = arith.constant 0 : i32
    %c0_i32_0 = arith.constant 0 : i32
    %c0_i32_1 = arith.constant 0 : i32
    return %c0_i32, %c0_i32_0 : i32, i32
  }
  func.func @transform_3(%arg0: i32) -> (i32, i32) {
    %c0_i32 = arith.constant 0 : i32
    %c0_i32_0 = arith.constant 0 : i32
    %c0_i32_1 = arith.constant 0 : i32
    return %c0_i32, %c0_i32_0 : i32, i32
  }
  func.func @transform_4(%arg0: i32) -> (i32, i32) {
    %c0_i32 = arith.constant 0 : i32
    %c0_i32_0 = arith.constant 0 : i32
    return %arg0, %c0_i32 : i32, i32
  }
  func.func @transform_5(%arg0: i32) -> (i32, i32) {
    %c0_i32 = arith.constant 0 : i32
    %c0_i32_0 = arith.constant 0 : i32
    return %arg0, %c0_i32 : i32, i32
  }
}

</mosaic_0001>

<bundles_post_ra>
// kernel: tpu_custom_call.1
= control target key start
LH: loop header
LB: loop body
LE: loop exit
PB: predicated region body
PF: predicated region fallthrough
CT: control target
= control target key end

     0   :  { %11 = vsyncpa [#allocation3], 0  ;;  %s1202_s0 = inlined_call_operand.vmem [shape: f32[128,8], index: 0, kind: input, shape index: {}]   ;;  %s1203_s1 = inlined_call_operand.vmem [shape: f32[8,128], index: 1, kind: input, shape index: {}]   ;;  %s1204_s2 = inlined_call_operand.vmem [shape: f32[128,2], index: 2, kind: input, shape index: {}]   ;;  %s1205_s3 = inlined_call_operand.vmem [shape: f32[1,2], index: 3, kind: input, shape index: {}]   ;;  %s1206_s4 = inlined_call_operand.hbm [shape: bf16[128,128], index: 4, kind: output, shape index: {0}]   ;;  %s1207_s5 = inlined_call_operand.vmem [shape: f32[128,2], index: 5, kind: output, shape index: {1}]  }
   0x1   :  { %13 = vsyncpa [#allocation3 + $0x1], 0  ;;  %s1006_s18 = smov 0   ;;  %s1008_s19 = smov 0  }
   0x2   :  { %s1010_s20 = smov 0   ;;  %s1012_s21 = smov 0  }
   0x3 LB: > { %s1027_s22 = sadd.s32 4294967295, %s971_s21   ;;  %s666_s23 = sadd.s32 4294967294, %s971_s21   ;;  %s971_s21 = sphi %s1012_s21, %s1213_s21   ;;  %s967_s20 = sphi %s1010_s20, %s1212_s20   ;;  %s963_s19 = sphi %s1008_s19, %s1211_s19   ;;  %s959_s18 = sphi %s1006_s18, %s1210_s18  }
   0x4   : > { %s1031_s24 = sadd.s32 1, %s971_s21   ;;  %s115_s25 = sadd.s32 1, %s967_s20 }
   0x5   : > { %s112_s26 = ssub.s32 %s971_s21, %s1031_s24  ;;  %p125_p0 = scmp.ne.s32.totalorder %s967_s20, %s963_s19 }
   0x6   : > { %p113_p1 = scmp.eq.s32.totalorder %s112_s26, 0  ;;  %p126_p2 = scmp.eq.s32.totalorder %s1027_s22, 1 }
   0x7   : > { %p131_p3 = scmp.ne.s32.totalorder %s963_s19, %s959_s18  ;;  %p132_p4 = scmp.eq.s32.totalorder %s666_s23, 1 }
   0x8   : > { %s1042_s27 = scalar_select %p113_p1, %s967_s20, %s115_s25  }
   0x9   : > { %p1044_p5 = por %p126_p2, %p125_p0  ;;  %p1048_p6 = por %p132_p4, %p131_p3 }
   0xa   : > { %p669_p7 = scmp.ge.s32.totalorder %s971_s21, 1  ;;  %p194_p8 = scmp.lt.s32.totalorder %s971_s21, 3 }
   0xc   : > { %p195_p9 = pnand %p669_p7, %p194_p8 }
   0xd   : > { %v248_v0 = vld [vmem:[%s1203_s1] sm:$0xff] (!%p195_p9)  ;;  %s671_s7 = sshll.u32 (!%p195_p9), %s1027_s22, 3  ;;  %v420_v2 = vld [vmem:[%s1204_s2 + $0x8] sm:$0xff] (!%p195_p9)  ;;  %v421_v4 = vld [vmem:[%s1204_s2 + $0x10] sm:$0xff] (!%p195_p9)  ;;  %vm249_vm0 = vcmask (!%p195_p9), 64512   ;;  %s217_s15 = sand.u32 (!%p195_p9), 1, %s963_s19  }
   0xe   : > { %198 = sbr.rel (%p195_p9) target bundleno = 468 (0x1d4), region = 36  ;;  %v419_v1 = vld [vmem:[%s1204_s2] sm:$0xff] (!%p195_p9)  ;;  %762 = vmatprep.subr.mxu0 (!%p195_p9), %v248_v0  ;;  %p228_p10 = scmp.lt.s32.totalorder (!%p195_p9), %s671_s7, 15  ;;  %v422_v5 = vld [vmem:[%s1204_s2 + $0x18] sm:$0xff] (!%p195_p9)  ;;  %v424_v8 = vld [vmem:[%s1204_s2 + $0x28] sm:$0xff] (!%p195_p9) }
   0xf   : > { %v820_v3 = vpack.c.bf16 (!%p195_p9), %v420_v2, %v419_v1  ;;  %763 = vmatpush3.msra.mxu0 (!%p195_p9), %v248_v0  ;;  %v824_v6 = vpack.c.bf16 (!%p195_p9), %v422_v5, %v421_v4  ;;  %v423_v7 = vld [vmem:[%s1204_s2 + $0x20] sm:$0xff] (!%p195_p9)  ;;  %v425_v13 = vld [vmem:[%s1204_s2 + $0x30] sm:$0xff] (!%p195_p9)  ;;  %v426_v14 = vld [vmem:[%s1204_s2 + $0x38] sm:$0xff] (!%p195_p9)  ;;  %s670_s16 = sshll.u32 (!%p195_p9), %s217_s15, 5  ;;  %s705_s25 = sshll.u32 (!%p195_p9), %s1027_s22, 9 }
  0x10   : > { %v828_v12 = vpack.c.bf16 (!%p195_p9), %v424_v8, %v423_v7  ;;  %v832_v17 = vpack.c.bf16 (!%p195_p9), %v426_v14, %v425_v13  ;;  %v427_v18 = vld [vmem:[%s1204_s2 + $0x40] sm:$0xff] (!%p195_p9)  ;;  %v428_v19 = vld [vmem:[%s1204_s2 + $0x48] sm:$0xff] (!%p195_p9)  ;;  %v429_v23 = vld [vmem:[%s1204_s2 + $0x50] sm:$0xff] (!%p195_p9)  ;;  %s219_s17 = scalar_lea.vmem (!%p195_p9), [#allocation2], %s670_s16  ;;  %s1141_s9 = scalar_lea.hbm (!%p195_p9), %s1206_s4, %s705_s25 }
  0x11   : > { %821 = vmatprep.subr.bf16.mxu0 (!%p195_p9), %v820_v3  ;;  %852 = vmatprep.subr.bf16.mxu1 (!%p195_p9), %v820_v3  ;;  %v836_v22 = vpack.c.bf16 (!%p195_p9), %v428_v19, %v427_v18  ;;  %v430_v24 = vld [vmem:[%s1204_s2 + $0x58] sm:$0xff] (!%p195_p9)  ;;  %v431_v27 = vld [vmem:[%s1204_s2 + $0x60] sm:$0xff] (!%p195_p9)  ;;  %v432_v28 = vld [vmem:[%s1204_s2 + $0x68] sm:$0xff] (!%p195_p9)  ;;  %s575_s23 = sshll.u32 (!%p195_p9), %s219_s17, 4  ;;  %s1145_s10 = scalar_lea.sflag (!%p195_p9), [#allocation3], %s217_s15  ;;  %s1135_s23 = int_to_ptr.vmem [resolvable:$true] %s575_s23 }
  0x12   : > { %860 = vmatpush3.bf16.msra.mxu1 (!%p195_p9), %v820_v3  ;;  %v840_v26 = vpack.c.bf16 (!%p195_p9), %v430_v24, %v429_v23  ;;  %v844_v29 = vpack.c.bf16 (!%p195_p9), %v432_v28, %v431_v27  ;;  %v433_v30 = vld [vmem:[%s1204_s2 + $0x70] sm:$0xff] (!%p195_p9)  ;;  %v434_v31 = vld [vmem:[%s1204_s2 + $0x78] sm:$0xff] (!%p195_p9)  ;;  %s909_s11 = scalar_lea.vmem (!%p195_p9), %s1135_s23, 512 }
  0x13   : > { %853 = vmatprep.subr.bf16.mxu1 (!%p195_p9), %v824_v6  ;;  %v848_v32 = vpack.c.bf16 (!%p195_p9), %v434_v31, %v433_v30  ;;  %p910_p11 = scmp.ne.s32.totalorder (!%p195_p9), %s1135_s23, %s909_s11 }
  0x15   : > { %s1215_s7 = smov (!%p228_p10, %s671_s7), 15  ;;  %p911_p12 = pnand %p910_p11, %p1044_p5 }
  0x16   : > { %s672_s26 = sshll.u32 %s1215_s7, 3  ;;  %861 = vmatpush3.bf16.msra.mxu1 %v824_v6 }
  0x17   : > { %s1084_s8 = scalar_lea.vmem %s1202_s0, %s672_s26  ;;  %854 = vmatprep.subr.bf16.mxu1 %v828_v12  ;;  %p912_p13 = pneg %p911_p12 }
  0x18   : > { %v240_v9 = vld [vmem:[%s1084_s8] sm:$0xff]  ;;  %v241_v10 = vld [vmem:[%s1084_s8 + $0x8] sm:$0xff]  ;;  %v242_v11 = vld [vmem:[%s1084_s8 + $0x10] sm:$0xff] }
  0x19   : > { %764 = vmatprep.mubr.msk.f32.mxu0 %vm249_vm0, %v240_v9  ;;  %v243_v15 = vld [vmem:[%s1084_s8 + $0x18] sm:$0xff]  ;;  %v244_v16 = vld [vmem:[%s1084_s8 + $0x20] sm:$0xff]  ;;  %v245_v20 = vld [vmem:[%s1084_s8 + $0x28] sm:$0xff] }
  0x1a   : > { %765 = vmatmul.mubr.msk.f32.vlgmr.msra.gmra.mrb[0].mxu0 %vm249_vm0, %v241_v10  ;;  %862 = vmatpush3.bf16.msra.mxu1 %v828_v12  ;;  %v246_v21 = vld [vmem:[%s1084_s8 + $0x30] sm:$0xff]  ;;  %v247_v25 = vld [vmem:[%s1084_s8 + $0x38] sm:$0xff]  ;;  %s973_s8 = smov [#allocation2]  }
  0x1b   : > { %767 = vmatprep.mubr.msk.f32.mxu0 %vm249_vm0, %v242_v11  ;;  %823 = vmatpush3.bf16.msra.mxu0 %v820_v3  ;;  %s913_s12 = sshll.u32 %s973_s8, 4  ;;  %s914_s12 = int_to_ptr.vmem [resolvable:$false] %s913_s12 }
  0x1c   : > { %825 = vmatprep.subr.bf16.mxu0 %v824_v6  ;;  %855 = vmatprep.subr.bf16.mxu1 %v832_v17  ;;  %s915_s13 = scalar_lea.vmem %s914_s12, 1024  ;;  %p916_p0 = scmp.lt.s32.totalorder %s1135_s23, %s914_s12 }
  0x1d   : > { %p917_p1 = scmp.lt.s32.totalorder %s915_s13, %s909_s11 }
  0x1e   : > { %768 = vmatmul.mubr.msk.f32.gmra.mrb[2].mxu0 %vm249_vm0, %v243_v15  ;;  %863 = vmatpush3.bf16.msra.mxu1 %v832_v17 }
  0x1f   : > { %770 = vmatprep.mubr.msk.f32.mxu0 %vm249_vm0, %v244_v16  ;;  %827 = vmatpush3.bf16.msra.mxu0 %v824_v6  ;;  %p918_p2 = por %p917_p1, %p916_p0 }
  0x20   : > { %829 = vmatprep.subr.bf16.mxu0 %v828_v12  ;;  %856 = vmatprep.subr.bf16.mxu1 %v836_v22 }
  0x21   : > { %p919_p3 = pnand %p918_p2, %p912_p13 }
  0x22   : > { %771 = vmatmul.mubr.msk.f32.gmra.mrb[4].mxu0 %vm249_vm0, %v245_v20  ;;  %864 = vmatpush3.bf16.msra.mxu1 %v836_v22 }
  0x23   : > { %773 = vmatprep.mubr.msk.f32.mxu0 %vm249_vm0, %v246_v21  ;;  %831 = vmatpush3.bf16.msra.mxu0 %v828_v12 }
  0x24   : > { %833 = vmatprep.subr.bf16.mxu0 %v832_v17  ;;  %857 = vmatprep.subr.bf16.mxu1 %v840_v26 }
  0x26   : > { %774 = vmatmul.mubr.msk.f32.gmra.mrb[6].mxu0 %vm249_vm0, %v247_v25  ;;  %865 = vmatpush3.bf16.msra.mxu1 %v840_v26 }
  0x27   : > { %835 = vmatpush3.bf16.msra.mxu0 %v832_v17  ;;  %858 = vmatprep.subr.bf16.mxu1 %v844_v29 }
  0x28   : > { %837 = vmatprep.subr.bf16.mxu0 %v836_v22 }
  0x2a   : > { %866 = vmatpush3.bf16.msra.mxu1 %v844_v29 }
  0x2b   : > { %839 = vmatpush3.bf16.msra.mxu0 %v836_v22  ;;  %859 = vmatprep.subr.bf16.mxu1 %v848_v32 }
  0x2c   : > { %841 = vmatprep.subr.bf16.mxu0 %v840_v26 }
  0x2e   : > { %867 = vmatpush3.bf16.msra.mxu1 %v848_v32 }
  0x2f   : > { %843 = vmatpush3.bf16.msra.mxu0 %v840_v26 }
  0x30   : > { %845 = vmatprep.subr.bf16.mxu0 %v844_v29 }
  0x33   : > { %847 = vmatpush3.bf16.msra.mxu0 %v844_v29 }
  0x34   : > { %849 = vmatprep.subr.bf16.mxu0 %v848_v32 }
  0x37   : > { %851 = vmatpush3.bf16.msra.mxu0 %v848_v32 }
  0xed   : > { %v766_v33 = vpop.f32.mrb[0].mxu0 }
  0xee   : > { %v340_v34 = vpop.f32.mrb[1].mxu0 }
  0xef   : > { %v709_v35 = vpack.c.bf16 %v766_v33, %v340_v34  ;;  %808 = vmatprep.mubr.f32.mxu0 %v340_v34 }
  0xf0   : > { %809 = vmatmul.mubr.f32.vlgmr.msra.gmra.mrb[8].mxu0 %v766_v33 }
  0xf1   : > { %710 = vst [vmem:[%s219_s17] sm:$0xff] %v709_v35   ;;  %v769_v36 = vpop.f32.mrb[2].mxu0 }
  0xf2   : > { %v350_v37 = vpop.f32.mrb[3].mxu0 }
  0xf3   : > { %v714_v38 = vpack.c.bf16 %v769_v36, %v350_v37  ;;  %811 = vmatprep.mubr.f32.mxu1 %v350_v37 }
  0xf4   : > { %812 = vmatmul.mubr.f32.vlgmr.msra.gmra.mrb[0].mxu1 %v769_v36 }
  0xf5   : > { %726 = vst [vmem:[%s219_s17 + $0x8] sm:$0xff] %v714_v38   ;;  %v772_v39 = vpop.f32.mrb[4].mxu0 }
  0xf6   : > { %v360_v40 = vpop.f32.mrb[5].mxu0 }
  0xf7   : > { %v719_v41 = vpack.c.bf16 %v772_v39, %v360_v40  ;;  %814 = vmatprep.mubr.f32.mxu1 %v360_v40 }
  0xf8   : > { %815 = vmatmul.mubr.f32.gmra.mrb[2].mxu1 %v772_v39 }
  0xf9   : > { %727 = vst [vmem:[%s219_s17 + $0x10] sm:$0xff] %v719_v41   ;;  %v775_v42 = vpop.f32.mrb[6].mxu0 }
  0xfa   : > { %v370_v43 = vpop.f32.mrb[7].mxu0 }
  0xfb   : > { %v724_v44 = vpack.c.bf16 %v775_v42, %v370_v43  ;;  %817 = vmatprep.mubr.f32.mxu1 %v370_v43 }
  0xfc   : > { %818 = vmatmul.mubr.f32.gmra.mrb[4].mxu1 %v775_v42 }
  0xfd   : > { %728 = vst [vmem:[%s219_s17 + $0x18] sm:$0xff] %v724_v44  }
  0xfe   : > { %922 = shalt.err (!%p919_p3)
}
  0xff   : > { %s923_s22 = scalar_lea.hbm %s1141_s9, 512  ;;  %s927_s16 = scalar_lea.hbm %s1206_s4, 1024 }
 0x100   : > { %p924_p4 = scmp.ne.s32.totalorder %s1141_s9, %s923_s22  ;;  %p928_p9 = scmp.lt.u32.totalorder %s1141_s9, %s1206_s4 }
 0x101   : > { %p929_p10 = scmp.lt.u32.totalorder %s927_s16, %s923_s22  ;;  %p931_p12 = scmp.lt.u32.totalorder %s923_s22, %s1141_s9 }
 0x102   : > { %p925_p7 = pnand %p924_p4, %p1044_p5 }
 0x103   : > { %p930_p11 = por %p929_p10, %p928_p9 }
 0x104   : > { %p926_p8 = pneg %p925_p7 }
 0x105   : > { %p932_p13 = por %p931_p12, %p930_p11 }
 0x107   : > { %p933_p0 = pnand %p932_p13, %p926_p8 }
 0x109   : > { %936 = shalt.err (!%p933_p0)
}
 0x10a   : > { %s974_s30 = smov 64   ;;  %s975_s6 = smov 4   ;;  %v691_v45 = vld [vmem:[%s1205_s3] ss:$0 sm:$0xff]  ;;  %vm547_vm1 = vcmask 15360  }
 0x10b   : > { %868 = dma.vmem_to_hbm [thread:$0]  (%p1044_p5), %s1135_s23, 512, %s1141_s9, %s1145_s10, %s974_s30, %s974_s30, %s975_s6  }
 0x10c   : > { %s238_s22 = scalar_lea.vmem %s1207_s5, %s672_s26 }
 0x1c3   : > { %v810_v46 = vpop.f32.mrb[8].mxu0 }
 0x1c4   : > { %v514_v47 = vadd.f32 %v810_v46, %v691_v45  ;;  %v508_v48 = vpop.f32.mrb[9].mxu0 }
 0x1c5   : > { %v509_v49 = vadd.f32 %v691_v45, %v508_v48 }
 0x1c6   : > { %549 = vst.msk [vmem:[%s238_s22 + $0x8] sm:$0xff] %vm547_vm1, %v514_v47 }
 0x1c7   : > { %548 = vst.msk [vmem:[%s238_s22] sm:$0xff] %vm547_vm1, %v509_v49  ;;  %v813_v50 = vpop.f32.mrb[0].mxu1 }
 0x1c8   : > { %v524_v51 = vadd.f32 %v813_v50, %v691_v45  ;;  %v518_v52 = vpop.f32.mrb[1].mxu1 }
 0x1c9   : > { %v519_v53 = vadd.f32 %v691_v45, %v518_v52 }
 0x1ca   : > { %551 = vst.msk [vmem:[%s238_s22 + $0x18] sm:$0xff] %vm547_vm1, %v524_v51 }
 0x1cb   : > { %550 = vst.msk [vmem:[%s238_s22 + $0x10] sm:$0xff] %vm547_vm1, %v519_v53  ;;  %v816_v54 = vpop.f32.mrb[2].mxu1 }
 0x1cc   : > { %v534_v55 = vadd.f32 %v816_v54, %v691_v45  ;;  %v528_v56 = vpop.f32.mrb[3].mxu1 }
 0x1cd   : > { %v529_v57 = vadd.f32 %v691_v45, %v528_v56 }
 0x1ce   : > { %553 = vst.msk [vmem:[%s238_s22 + $0x28] sm:$0xff] %vm547_vm1, %v534_v55 }
 0x1cf   : > { %552 = vst.msk [vmem:[%s238_s22 + $0x20] sm:$0xff] %vm547_vm1, %v529_v57  ;;  %v819_v58 = vpop.f32.mrb[4].mxu1 }
 0x1d0   : > { %v544_v59 = vadd.f32 %v819_v58, %v691_v45  ;;  %v538_v60 = vpop.f32.mrb[5].mxu1 }
 0x1d1   : > { %v539_v61 = vadd.f32 %v691_v45, %v538_v60 }
 0x1d2   : > { %555 = vst.msk [vmem:[%s238_s22 + $0x38] sm:$0xff] %vm547_vm1, %v544_v59 }
 0x1d3   : > { %554 = vst.msk [vmem:[%s238_s22 + $0x30] sm:$0xff] %vm547_vm1, %v539_v61 }
 0x1d4 PF: > { %p874_p5 = scmp.ge.s32.totalorder %s971_s21, 2  ;;  %s594_s28 = sand.u32 1, %s959_s18  }
 0x1d5   : > { %s595_s7 = scalar_lea.sflag [#allocation3], %s594_s28 }
 0x1d6   : > { %p871_p1 = pnand %p874_p5, %p1048_p6 }
 0x1d8   : > { %954 = dma.done.wait (!%p871_p1), %s595_s7, 512  }
 0x1d9   : > { %956 = vsyncadd (!%p871_p1), %s595_s7, 4294966784  ;;  %p16_p2 = scmp.ge.s32.totalorder %s1031_s24, 4   ;;  %s1210_s18 = smov %s963_s19 }
 0x1da   : > { %s1211_s19 = smov %s967_s20  ;;  %s1212_s20 = smov %s1042_s27 }
 0x1db   : > { %s1213_s21 = smov %s1031_s24  ;;  %18 = sbr.rel (!%p16_p2) target bundleno = 3 (0x3), region = 83 }
 0x1e2   :  { %608 = vsyncpa [#allocation3], 1 }
 0x1e3   :  { %610 = vsyncpa [#allocation3 + $0x1], 1 }

</bundles_post_ra>
